<compile_context>
chip_gen: v6e
topology: v6e:2x2x1
jax: 0.10.0
libtpu: 0.0.40
codegen_flags: <defaults>
</compile_context>

<pallas_src>
import jax
import jax.numpy as jnp
from jax.experimental import pallas as pl
from jax.experimental.pallas import tpu as pltpu


_LANE = 128              # lane width of a vreg
_MAX_TILE_B = 16 * 1024  # upper bound on lanes per grid step (keeps vreg pressure sane)
_MIN_SPLIT_B = 8 * 1024  # only split a single-step grid if each half keeps >= this many lanes


def _round_up(x, m):
    return ((x + m - 1) // m) * m


def _round_down(x, m):
    return (x // m) * m


# ----------------------------- Pallas kernels ------------------------------

def _mirt_kernel_guess(theta_ref, alpha_ref, beta_ref, guess_ref, out_ref):
    # theta/alpha: [dim, TILE_B] (bf16 on the wire); beta/guess: [1, TILE_B] f32.
    t = theta_ref[...].astype(jnp.float32)
    a = alpha_ref[...].astype(jnp.float32)
    s = jnp.sum(a * t, axis=0, keepdims=True)          # sublane reduce -> [1, TILE_B]
    pred = jax.nn.sigmoid(s - beta_ref[...])           # EUP
    g = jax.nn.sigmoid(guess_ref[...])
    out_ref[...] = g + (1.0 - g) * pred


def _mirt_kernel_noguess(theta_ref, alpha_ref, beta_ref, out_ref):
    t = theta_ref[...].astype(jnp.float32)
    a = alpha_ref[...].astype(jnp.float32)
    s = jnp.sum(a * t, axis=0, keepdims=True)
    out_ref[...] = jax.nn.sigmoid(s - beta_ref[...])


# ----------------------------- Tile selection --------------------------------

def _pick_tile(b0, dim, n_side, wire_bytes):
    """VMEM-budget-driven lane tile + vmem limit (generation aware)."""
    try:
        vmem_cap = int(pltpu.get_tpu_info().vmem_capacity_bytes)
    except Exception:
        vmem_cap = 64 * 1024 * 1024  # conservative fallback (v7x per-TC VMEM)
    budget = min(vmem_cap // 2, 48 * 1024 * 1024)

    # Bytes of VMEM per lane per pipelined step: theta + alpha (wire dtype),
    # side rows + output (f32); everything is double-buffered by the pipeline.
    bytes_per_lane = 2 * dim * wire_bytes + (n_side + 1) * 4
    tile_cap = max(_LANE, _round_down(budget // (2 * bytes_per_lane), _LANE))
    tile_b = min(b0, min(tile_cap, _MAX_TILE_B))

    # Megacore (v7x): make sure a large single-step grid becomes >=2 steps so
    # both TensorCores get work, but never shrink blocks just to create steps.
    if tile_b == b0 and b0 >= 2 * _MIN_SPLIT_B:
        tile_b = _round_up(b0 // 2, _LANE)

    vmem_limit = 2 * bytes_per_lane * tile_b + (8 << 20)   # blocks + headroom
    vmem_limit = int(min(max(vmem_limit, 32 << 20), vmem_cap))
    return tile_b, vmem_limit


# ------------------------------- Wrapper ------------------------------------

def mirt_forward(params, stu_id, exer_id, kn_emb, *, use_guess):
    """Pallas-backed MIRT forward.

    Embedding gathers stay in XLA but read pre-transposed (lane-dense) tables,
    so the only per-call HBM traffic outside the kernel is the gather itself.
    """
    del kn_emb  # unused by the reference forward
    # TODO(synk): fully fuse the gathers into the kernel (scalar-prefetch ids in
    # SMEM + VMEM-resident tables) once in-kernel row gather is needed at scale.
    B = int(stu_id.shape[0])
    dim = params["thetas_t"].shape[0]
    wire_bytes = jnp.dtype(params["thetas_t"].dtype).itemsize
    n_side = 2 if use_guess else 1

    b0 = _round_up(B, _LANE)
    tile_b, vmem_limit = _pick_tile(b0, dim, n_side, wire_bytes)
    b_pad = _round_up(B, tile_b)

    # Pad the cheap int32 id vectors (index 0 is always valid); the padded tail
    # lanes are computed and sliced off at the end — never the big activations.
    pad = b_pad - B
    stu = jnp.pad(stu_id.astype(jnp.int32), (0, pad))
    exer = jnp.pad(exer_id.astype(jnp.int32), (0, pad))

    # Lane-dense gathers straight out of the pre-transposed tables: no per-call
    # transpose / pad / concat passes over [dim, B] activations.
    theta_t = jnp.take(params["thetas_t"], stu, axis=1)       # [dim, b_pad] bf16
    alpha_t = jnp.take(params["alphas_t"], exer, axis=1)      # [dim, b_pad] bf16
    beta_t = jnp.take(params["betas_t"], exer, axis=1)        # [1, b_pad]   f32

    inputs = [theta_t, alpha_t, beta_t]
    side_specs = [pl.BlockSpec((1, tile_b), lambda i: (0, i))]
    if use_guess:
        guess_t = jnp.take(params["guess_t"], exer, axis=1)   # [1, b_pad] f32
        inputs.append(guess_t)
        side_specs.append(pl.BlockSpec((1, tile_b), lambda i: (0, i)))
        kernel = _mirt_kernel_guess
    else:
        kernel = _mirt_kernel_noguess

    grid = (b_pad // tile_b,)

    pred = pl.pallas_call(
        kernel,
        out_shape=jax.ShapeDtypeStruct((1, b_pad), jnp.float32),
        grid_spec=pltpu.PrefetchScalarGridSpec(
            num_scalar_prefetch=0,
            grid=grid,
            in_specs=[
                pl.BlockSpec((dim, tile_b), lambda i: (0, i)),
                pl.BlockSpec((dim, tile_b), lambda i: (0, i)),
            ] + side_specs,
            out_specs=pl.BlockSpec((1, tile_b), lambda i: (0, i)),
        ),
        compiler_params=pltpu.CompilerParams(
            dimension_semantics=("parallel",),   # batch loop (megacore-shardable)
            vmem_limit_bytes=vmem_limit,
        ),
    )(*inputs)

    return pred[0, :B]  # matches pred.view(-1)


# ------------------------- Deterministic parameter init ---------------------

def _xavier_normal(key, shape):
    # nn.init.xavier_normal_: std = sqrt(2 / (fan_in + fan_out)); for a 2-D
    # weight of shape (n, d), fan_in = d, fan_out = n.
    fan_out, fan_in = shape
    std = (2.0 / (fan_in + fan_out)) ** 0.5
    return std * jax.random.normal(key, shape, dtype=jnp.float32)


def init_mirt_params(key, num_users, exer_n, knowledge_n, dim, use_guess,
                     wire_dtype=jnp.bfloat16):
    keys = jax.random.split(key, 6)
    thetas = _xavier_normal(keys[0], (num_users, dim))
    alphas = _xavier_normal(keys[1], (exer_n, dim))
    betas = _xavier_normal(keys[2], (exer_n, 1))
    params = {
        # f32 master copies (reference semantics).
        "thetas": thetas,
        "alphas": alphas,
        "betas": betas,
        # knowledge_layer is part of __init__ but unused in forward; kept for parity.
        "knowledge_layer_w": _xavier_normal(keys[3], (1, knowledge_n)),
        "knowledge_layer_b": jnp.zeros((1,), jnp.float32),
        # Pre-transposed, lane-friendly "wire" copies built once at init:
        # theta/alpha in bf16 (halves HBM bytes on the mem-bound hot path),
        # beta/guess as f32 rows.
        "thetas_t": thetas.T.astype(wire_dtype),     # [dim, num_users]
        "alphas_t": alphas.T.astype(wire_dtype),     # [dim, exer_n]
        "betas_t": betas.T,                          # [1, exer_n]
    }
    if use_guess:
        guess = _xavier_normal(keys[4], (exer_n, 1))
        params["guess_param"] = guess
        params["guess_t"] = guess.T                  # [1, exer_n]
    return params


# ------------------------------ Reference (JAX) -----------------------------

def mirt_reference(params, stu_id, exer_id, kn_emb, *, use_guess):
    theta = params["thetas"][stu_id]
    alpha = params["alphas"][exer_id]
    beta = params["betas"][exer_id]
    pred = jax.nn.sigmoid(jnp.sum(alpha * theta, axis=1, keepdims=True) - beta)
    if use_guess:
        g = jax.nn.sigmoid(params["guess_param"][exer_id])
        pred = g + (1.0 - g) * pred
    return pred.reshape(-1)


# --------------------------------- Main --------------------------------------

if __name__ == "__main__":
    num_users, exer_n, knowledge_n, dim = 20, 30, 16, 32
    batch = 8
    use_guess = True

    key = jax.random.PRNGKey(0)
    k_params, k_stu, k_exer, k_kn = jax.random.split(key, 4)

    params = init_mirt_params(k_params, num_users, exer_n, knowledge_n, dim, use_guess)
    stu_id = jax.random.randint(k_stu, (batch,), 0, num_users, dtype=jnp.int32)
    exer_id = jax.random.randint(k_exer, (batch,), 0, exer_n, dtype=jnp.int32)
    kn_emb = jax.random.uniform(k_kn, (batch, knowledge_n), dtype=jnp.float32)

    out = mirt_forward(params, stu_id, exer_id, kn_emb, use_guess=use_guess)
    out = jax.block_until_ready(out)

    ref = mirt_reference(params, stu_id, exer_id, kn_emb, use_guess=use_guess)
    assert out.shape == (batch,), out.shape
    # theta/alpha travel in bf16 on the wire -> relaxed tolerance vs f32 reference.
    assert jnp.allclose(out, ref, atol=1e-2, rtol=1e-2), (out, ref)

    # Also exercise the no-guess path and a larger batch.
    big_batch = 1500
    kb1, kb2 = jax.random.split(jax.random.PRNGKey(1))
    stu_big = jax.random.randint(kb1, (big_batch,), 0, num_users, dtype=jnp.int32)
    exer_big = jax.random.randint(kb2, (big_batch,), 0, exer_n, dtype=jnp.int32)
    out_big = jax.block_until_ready(
        mirt_forward(params, stu_big, exer_big, None, use_guess=False))
    ref_big = mirt_reference(params, stu_big, exer_big, None, use_guess=False)
    assert out_big.shape == (big_batch,)
    assert jnp.allclose(out_big, ref_big, atol=1e-2, rtol=1e-2)

    print("KERNEL_OK")
</pallas_src>

<mosaic_0001>
module attributes {stable_mosaic.version = 11 : i64} {
  func.func @_mirt_kernel_guess(%arg0: i32, %arg1: memref<32x128xbf16, #tpu.memory_space<vmem>>, %arg2: memref<32x128xbf16, #tpu.memory_space<vmem>>, %arg3: memref<1x128xf32, #tpu.memory_space<vmem>>, %arg4: memref<1x128xf32, #tpu.memory_space<vmem>>, %arg5: memref<1x128xf32, #tpu.memory_space<vmem>>) attributes {dimension_semantics = [#tpu.dimension_semantics<parallel>], iteration_bounds = array<i64: 1>, scalar_prefetch = 0 : i64, scratch_operands = 0 : i64, tpu.core_type = #tpu.core_type<tc>, window_params = [{transform_indices = @transform_0, window_bounds = array<i64: 32, 128>}, {transform_indices = @transform_1, window_bounds = array<i64: 32, 128>}, {transform_indices = @transform_2, window_bounds = array<i64: 1, 128>}, {transform_indices = @transform_3, window_bounds = array<i64: 1, 128>}, {transform_indices = @transform_4, window_bounds = array<i64: 1, 128>}]} {
    %c0 = arith.constant 0 : index
    %c0_0 = arith.constant 0 : index
    %0 = vector.load %arg1[%c0, %c0_0] : memref<32x128xbf16, #tpu.memory_space<vmem>>, vector<32x128xbf16>
    %1 = arith.extf %0 : vector<32x128xbf16> to vector<32x128xf32>
    %c0_1 = arith.constant 0 : index
    %c0_2 = arith.constant 0 : index
    %2 = vector.load %arg2[%c0_1, %c0_2] : memref<32x128xbf16, #tpu.memory_space<vmem>>, vector<32x128xbf16>
    %3 = arith.extf %2 : vector<32x128xbf16> to vector<32x128xf32>
    %4 = arith.mulf %3, %1 : vector<32x128xf32>
    %cst = arith.constant dense<0.000000e+00> : vector<128xf32>
    %5 = vector.multi_reduction <add>, %4, %cst [0] : vector<32x128xf32> to vector<128xf32>
    %6 = vector.shape_cast %5 : vector<128xf32> to vector<1x128xf32>
    %c0_3 = arith.constant 0 : index
    %c0_4 = arith.constant 0 : index
    %7 = vector.load %arg3[%c0_3, %c0_4] : memref<1x128xf32, #tpu.memory_space<vmem>>, vector<1x128xf32>
    %8 = arith.subf %6, %7 : vector<1x128xf32>
    %9 = arith.negf %8 : vector<1x128xf32>
    %10 = math.exp %9 : vector<1x128xf32>
    %cst_5 = arith.constant 1.000000e+00 : f32
    %11 = vector.broadcast %cst_5 : f32 to vector<1x128xf32>
    %12 = arith.addf %11, %10 : vector<1x128xf32>
    %13 = arith.divf %11, %12 : vector<1x128xf32>
    %c0_6 = arith.constant 0 : index
    %c0_7 = arith.constant 0 : index
    %14 = vector.load %arg4[%c0_6, %c0_7] : memref<1x128xf32, #tpu.memory_space<vmem>>, vector<1x128xf32>
    %15 = arith.negf %14 : vector<1x128xf32>
    %16 = math.exp %15 : vector<1x128xf32>
    %cst_8 = arith.constant 1.000000e+00 : f32
    %17 = vector.broadcast %cst_8 : f32 to vector<1x128xf32>
    %18 = arith.addf %17, %16 : vector<1x128xf32>
    %19 = arith.divf %17, %18 : vector<1x128xf32>
    %cst_9 = arith.constant 1.000000e+00 : f32
    %20 = vector.broadcast %cst_9 : f32 to vector<1x128xf32>
    %21 = arith.subf %20, %19 : vector<1x128xf32>
    %22 = arith.mulf %21, %13 : vector<1x128xf32>
    %23 = arith.addf %19, %22 : vector<1x128xf32>
    %c0_10 = arith.constant 0 : index
    %c0_11 = arith.constant 0 : index
    %24 = vector.load %arg5[%c0_10, %c0_11] : memref<1x128xf32, #tpu.memory_space<vmem>>, vector<1x128xf32>
    tpu.vector_store %arg5[%c0_10, %c0_11], %23 {strides = array<i32>} : memref<1x128xf32, #tpu.memory_space<vmem>>, vector<1x128xf32>,
    return
  }
  func.func @transform_0(%arg0: i32) -> (i32, i32) {
    %c0_i32 = arith.constant 0 : i32
    %c0_i32_0 = arith.constant 0 : i32
    return %c0_i32, %arg0 : i32, i32
  }
  func.func @transform_1(%arg0: i32) -> (i32, i32) {
    %c0_i32 = arith.constant 0 : i32
    %c0_i32_0 = arith.constant 0 : i32
    return %c0_i32, %arg0 : i32, i32
  }
  func.func @transform_2(%arg0: i32) -> (i32, i32) {
    %c0_i32 = arith.constant 0 : i32
    %c0_i32_0 = arith.constant 0 : i32
    return %c0_i32, %arg0 : i32, i32
  }
  func.func @transform_3(%arg0: i32) -> (i32, i32) {
    %c0_i32 = arith.constant 0 : i32
    %c0_i32_0 = arith.constant 0 : i32
    return %c0_i32, %arg0 : i32, i32
  }
  func.func @transform_4(%arg0: i32) -> (i32, i32) {
    %c0_i32 = arith.constant 0 : i32
    %c0_i32_0 = arith.constant 0 : i32
    return %c0_i32, %arg0 : i32, i32
  }
}

</mosaic_0001>

<bundles_post_ra>
// kernel: tpu_custom_call.1
= control target key start
LH: loop header
LB: loop body
LE: loop exit
PB: predicated region body
PF: predicated region fallthrough
CT: control target
= control target key end

     0   :  { %9 = vsyncpa [#allocation3], 0  ;;  %s254_s0 = inlined_call_operand.hbm [shape: bf16[32,128], index: 0, kind: input, shape index: {}]   ;;  %s255_s1 = inlined_call_operand.hbm [shape: bf16[32,128], index: 1, kind: input, shape index: {}]   ;;  %s256_s2 = inlined_call_operand.vmem [shape: f32[1,128], index: 2, kind: input, shape index: {}]   ;;  %s257_s3 = inlined_call_operand.vmem [shape: f32[1,128], index: 3, kind: input, shape index: {}]   ;;  %s258_s4 = inlined_call_operand.hbm [shape: f32[1,128], index: 4, kind: output, shape index: {}]  }
   0x1   :  { %10 = vsyncpa [#allocation6], 0 }
   0x2   :  { %11 = vsyncpa [#allocation4], 0  ;;  %s209_s15 = smov [#allocation2]  }
   0x3   :  { %s17_s16 = sshll.u32 %s209_s15, 4  ;;  %s18_s16 = int_to_ptr.vmem [resolvable:$true] %s17_s16 }
   0x4   :  { %s151_s17 = scalar_lea.vmem %s18_s16, 256  ;;  %p156_p1 = scmp.lt.s32.totalorder %s18_s16, %s18_s16 }
   0x5   :  { %p152_p0 = scmp.ne.s32.totalorder %s18_s16, %s151_s17  ;;  %p157_p2 = scmp.lt.s32.totalorder %s151_s17, %s151_s17 }
   0x7   :  { %p158_p3 = por %p157_p2, %p156_p1 }
   0x9   :  { %p159_p4 = pnand %p158_p3, %p152_p0 }
   0xb   :  { %162 = shalt.err (!%p159_p4)
}
   0xc   :  { %s210_s18 = smov 64   ;;  %s211_s19 = smov 4  }
   0xd   :  { %23 = dma.hbm_to_vmem [thread:$0]  %s254_s0, 256, %s18_s16, [#allocation3], %s210_s18, %s210_s18, %s211_s19  }
   0xe   :  { %s212_s22 = smov [#allocation5]  }
   0xf   :  { %s29_s23 = sshll.u32 %s212_s22, 4  ;;  %s30_s23 = int_to_ptr.vmem [resolvable:$true] %s29_s23 }
  0x10   :  { %s171_s24 = scalar_lea.vmem %s30_s23, 256  ;;  %p176_p6 = scmp.lt.s32.totalorder %s30_s23, %s30_s23 }
  0x11   :  { %p172_p5 = scmp.ne.s32.totalorder %s30_s23, %s171_s24  ;;  %p177_p7 = scmp.lt.s32.totalorder %s171_s24, %s171_s24 }
  0x13   :  { %p178_p8 = por %p177_p7, %p176_p6 }
  0x15   :  { %p179_p9 = pnand %p178_p8, %p172_p5 }
  0x17   :  { %182 = shalt.err (!%p179_p9)
}
  0x18   :  { %35 = dma.hbm_to_vmem [thread:$0]  %s255_s1, 256, %s30_s23, [#allocation6], %s210_s18, %s210_s18, %s211_s19  }
  0x19   :  { %203 = dma.done.wait [#allocation3], 256  }
  0x1a   :  { %204 = vsyncadd [#allocation3], 4294967040 }
  0x1b   :  { %205 = dma.done.wait [#allocation6], 256  }
  0x1c   :  { %206 = vsyncadd [#allocation6], 4294967040  ;;  %v113_v0 = vld [vmem:[#allocation2] sm:$0xff]   ;;  %v128_v1 = vld [vmem:[#allocation2 + $0x8] sm:$0xff]  }
  0x1d   :  { %v121_v2 = vld [vmem:[#allocation5] sm:$0xff]   ;;  %v114_v3 = vunpack.c.l.bf16 %v113_v0  ;;  %v115_v4 = vunpack.c.h.bf16 %v113_v0  ;;  %v118_v5 = vunpack.c.l.bf16 %v128_v1  ;;  %v119_v6 = vunpack.c.h.bf16 %v128_v1  ;;  %v129_v7 = vld [vmem:[#allocation5 + $0x8] sm:$0xff]   ;;  %v83_v19 = vld [vmem:[%s257_s3] sm:$0x1]  ;;  %s213_s3 = smov [#allocation7]  }
  0x1e   :  { %v122_v8 = vunpack.c.l.bf16 %v121_v2  ;;  %v123_v9 = vunpack.c.h.bf16 %v121_v2  ;;  %v126_v10 = vunpack.c.l.bf16 %v129_v7  ;;  %v127_v11 = vunpack.c.h.bf16 %v129_v7  ;;  %v75_v26 = vld [vmem:[%s256_s2] sm:$0x1]  ;;  %s100_s29 = sshll.u32 %s213_s3, 4  ;;  %s101_s29 = int_to_ptr.vmem [resolvable:$true] %s100_s29 }
  0x1f   :  { %v111_v22 = vmul.f32 -1.442695, %v83_v19  ;;  %s183_s2 = scalar_lea.vmem %s101_s29, 16  ;;  %s187_s30 = scalar_lea.vmem %s101_s29, 32 }
  0x20   :  { %v62_v12 = vmul.f32 %v122_v8, %v114_v3  ;;  %v63_v13 = vmul.f32 %v123_v9, %v115_v4  ;;  %v64_v14 = vmul.f32 %v126_v10, %v118_v5  ;;  %v65_v15 = vmul.f32 %v127_v11, %v119_v6  ;;  %p184_p10 = scmp.ne.s32.totalorder %s101_s29, %s183_s2  ;;  %p188_p11 = scmp.lt.s32.totalorder %s101_s29, %s101_s29 }
  0x21   :  { %135 = vpow2.f32 %v111_v22  ;;  %p189_p12 = scmp.lt.s32.totalorder %s187_s30, %s183_s2 }
  0x22   :  { %v66_v16 = vadd.f32 %v63_v13, %v62_v12 }
  0x23   :  { %p190_p13 = por %p189_p12, %p188_p11 }
  0x24   :  { %v67_v17 = vadd.f32 %v66_v16, %v64_v14 }
  0x25   :  { %p191_p0 = pnand %p190_p13, %p184_p10 }
  0x26   :  { %v68_v18 = vadd.f32 %v67_v17, %v65_v15 }
  0x28   :  { %v69_v20 = vrot.slane %v68_v18, 4 }
  0x2a   :  { %v70_v21 = vadd.f32 %v69_v20, %v68_v18 }
  0x2c   :  { %v71_v23 = vrot.slane %v70_v21, 2 }
  0x2e   :  { %v72_v24 = vadd.f32 %v71_v23, %v70_v21  ;;  %v136_v30 = vpop.eup %135 }
  0x2f   :  { %v87_v31 = vadd.f32 1.0, %v136_v30 }
  0x30   :  { %v73_v25 = vrot.slane %v72_v24, 1 }
  0x32   :  { %v74_v27 = vadd.f32 %v73_v25, %v72_v24 }
  0x34   :  { %v76_v28 = vsub.f32 %v74_v27, %v75_v26 }
  0x36   :  { %v110_v29 = vmul.f32 -1.442695, %v76_v28 }
  0x38   :  { %137 = vpow2.f32 %v110_v29 }
  0x39   :  { %139 = vrcp.f32 %v87_v31 }
  0x45   :  { %v138_v32 = vpop.eup %137 }
  0x46   :  { %v80_v33 = vadd.f32 1.0, %v138_v32  ;;  %v140_v34 = vpop.eup %139 }
  0x47   :  { %v90_v35 = vsub.f32 1.0, %v140_v34 }
  0x48   :  { %141 = vrcp.f32 %v80_v33 }
  0x55   :  { %v142_v36 = vpop.eup %141 }
  0x56   :  { %v91_v37 = vmul.f32 %v142_v36, %v90_v35 }
  0x58   :  { %v92_v38 = vadd.f32 %v140_v34, %v91_v37 }
  0x5a   :  { %93 = vst [vmem:[#allocation7] sm:$0x1] %v92_v38 }
  0x5b   :  { %194 = shalt.err (!%p191_p0)
}
  0x5c   :  { %103 = dma.vmem_to_hbm [thread:$0]  %s101_s29, 16, %s258_s4, [#allocation4]  }
  0x5d   :  { %207 = dma.done.wait [#allocation4], 16  }
  0x5e   :  { %208 = vsyncadd [#allocation4], 4294967280 }
  0x5f   :  { %107 = vsyncpa [#allocation3], 1 }
  0x60   :  { %108 = vsyncpa [#allocation6], 1 }
  0x61   :  { %109 = vsyncpa [#allocation4], 1 }

</bundles_post_ra>
